<compile_context>
chip_gen: v5e
topology: v5e:2x2
jax: 0.10.0
libtpu: 0.0.40
codegen_flags: <defaults>
</compile_context>

<pallas_src>
import functools

import jax
import jax.numpy as jnp
from jax.experimental import pallas as pl
from jax.experimental.pallas import tpu as pltpu


def _encoder_layer_kernel(
    x_ref,        # (B*S, H)
    wqkv_ref,     # (H, 3H)   (in,out); columns = [Q heads | K heads | V heads], head-major
    bqkv_ref,     # (1, 3H)
    wo_ref,       # (H, H)    (in,out)
    bo_ref,       # (1, H)
    wup_ref,      # (H, d_ff) (in,out)
    bup_ref,      # (1, d_ff)
    wdown_ref,    # (d_ff, H) (in,out)
    bdown_ref,    # (1, H)
    out_ref,      # (B*S, H)
    att_ref,      # (B, S, num_heads*S)
    *,
    batch,
    seq,
    num_heads,
    dk,
):
    H = num_heads * dk
    inv_sqrt_dk = jnp.float32(1.0 / (float(dk) ** 0.5))

    x = x_ref[...]  # (B*S, H)

    # One wide fused QKV projection on the MXU: (B*S,H) @ (H,3H).
    qkv = jnp.dot(x, wqkv_ref[...], preferred_element_type=jnp.float32) + bqkv_ref[...]

    att_heads = []
    ctx_heads = []
    # Heads form a short static loop (num_heads=4); per-head work is two small
    # batched einsums on already-projected activations (no weights touched).
    for h in range(num_heads):
        q = qkv[:, h * dk:(h + 1) * dk].reshape(batch, seq, dk)            # (B,S,dk)
        k = qkv[:, H + h * dk:H + (h + 1) * dk].reshape(batch, seq, dk)    # (B,S,dk)
        v = qkv[:, 2 * H + h * dk:2 * H + (h + 1) * dk].reshape(batch, seq, dk)

        q = q * inv_sqrt_dk                                                # fold 1/sqrt(dk)
        s = jnp.einsum("bsd,btd->bst", q, k,
                       preferred_element_type=jnp.float32)                 # (B,S,S)

        # numerically-stable softmax over the last axis
        m = jnp.max(s, axis=-1, keepdims=True)
        e = jnp.exp(s - m)
        denom = jnp.sum(e, axis=-1, keepdims=True)
        p = e * pl.reciprocal(denom)                                       # (B,S,S)

        att_heads.append(p)
        ctx = jnp.einsum("bst,btd->bsd", p, v,
                         preferred_element_type=jnp.float32)               # (B,S,dk)
        ctx_heads.append(ctx.reshape(batch * seq, dk))

    # Single lane-denser attention-weights store: (B, S, nh*S).
    att_ref[...] = jnp.concatenate(att_heads, axis=-1)

    # Concatenate head contexts along lanes -> (B*S, H), then output proj + FF.
    attn = jnp.concatenate(ctx_heads, axis=-1)
    y = jnp.dot(attn, wo_ref[...], preferred_element_type=jnp.float32) + bo_ref[...]

    hdn = jnp.dot(y, wup_ref[...], preferred_element_type=jnp.float32) + bup_ref[...]
    hdn = jnp.maximum(hdn, 0.0)
    out_ref[...] = jnp.dot(hdn, wdown_ref[...],
                           preferred_element_type=jnp.float32) + bdown_ref[...]


def encoder_layer(x_sbH, params, *, num_heads):
    """x_sbH: (S, B, H) float32, PyTorch seq-first layout."""
    S, B, H = x_sbH.shape
    dk = H // num_heads
    d_ff = params["wup"].shape[0]

    # ---- layout plumbing in the wrapper (free XLA work, outside the kernel) ----
    x2d = jnp.transpose(x_sbH, (1, 0, 2)).reshape(B * S, H)       # (B*S, H)

    # Fuse per-head Q/K/V weights into one (H, 3H) matrix, (in, out) layout,
    # columns ordered head-major inside each Q/K/V block.
    wq_t = params["wq"].reshape(H, H).T                           # (H_in, H_out)
    wk_t = params["wk"].reshape(H, H).T
    wv_t = params["wv"].reshape(H, H).T
    wqkv = jnp.concatenate([wq_t, wk_t, wv_t], axis=1)            # (H, 3H)
    bqkv = jnp.concatenate([params["bq"].reshape(1, H),
                            params["bk"].reshape(1, H),
                            params["bv"].reshape(1, H)], axis=1)  # (1, 3H)

    wo_t = params["wo"].T                                         # (H, H)
    wup_t = params["wup"].T                                       # (H, d_ff)
    wdown_t = params["wdown"].T                                   # (d_ff, H)

    vmem = pl.BlockSpec(memory_space=pltpu.MemorySpace.VMEM)

    out2d, att_packed = pl.pallas_call(
        functools.partial(_encoder_layer_kernel,
                          batch=B, seq=S, num_heads=num_heads, dk=dk),
        out_shape=(
            jax.ShapeDtypeStruct((B * S, H), jnp.float32),
            jax.ShapeDtypeStruct((B, S, num_heads * S), jnp.float32),
        ),
        in_specs=[vmem] * 9,
        out_specs=(vmem, vmem),
    )(
        x2d,
        wqkv, bqkv,
        wo_t, params["bo"],
        wup_t, params["bup"],
        wdown_t, params["bdown"],
    )

    x_out = out2d.reshape(B, S, H).transpose(1, 0, 2)             # (S, B, H)
    att = att_packed.reshape(B, S, num_heads, S).transpose(2, 0, 1, 3)  # (nh,B,S,S)
    att_weights = [att[h] for h in range(num_heads)]
    return x_out, att_weights


def reference_encoder_layer(x, params, *, num_heads):
    """Plain-JAX reference mirroring the PyTorch forward (x: (S,B,H))."""
    dk = x.shape[-1] // num_heads
    heads = []
    atts = []
    for h in range(num_heads):
        Q = jnp.einsum("sbh,dh->sbd", x, params["wq"][h]) + params["bq"][h, 0]
        K = jnp.einsum("sbh,dh->sbd", x, params["wk"][h]) + params["bk"][h, 0]
        V = jnp.einsum("sbh,dh->sbd", x, params["wv"][h]) + params["bv"][h, 0]
        QKt = jnp.einsum("ibk,jbk->bij", Q, K) / jnp.sqrt(jnp.float32(dk))
        p = jax.nn.softmax(QKt, axis=2)
        heads.append(jnp.einsum("bik,kbj->ibj", p, V))
        atts.append(p)
    attn = jnp.concatenate(heads, axis=2)
    y = jnp.einsum("sbh,oh->sbo", attn, params["wo"]) + params["bo"][0]
    up = jax.nn.relu(jnp.einsum("sbh,fh->sbf", y, params["wup"]) + params["bup"][0])
    out = jnp.einsum("sbf,hf->sbh", up, params["wdown"]) + params["bdown"][0]
    return out, atts


def init_params(key, hidden_dim, d_ff, num_heads):
    dk = hidden_dim // num_heads
    ks = jax.random.split(key, 13)

    def u(k, shape, fan_in):
        bound = 1.0 / jnp.sqrt(jnp.float32(fan_in))
        return jax.random.uniform(k, shape, jnp.float32, -bound, bound)

    return {
        "wq": u(ks[0], (num_heads, dk, hidden_dim), hidden_dim),
        "bq": u(ks[1], (num_heads, 1, dk), hidden_dim),
        "wk": u(ks[2], (num_heads, dk, hidden_dim), hidden_dim),
        "bk": u(ks[3], (num_heads, 1, dk), hidden_dim),
        "wv": u(ks[4], (num_heads, dk, hidden_dim), hidden_dim),
        "bv": u(ks[5], (num_heads, 1, dk), hidden_dim),
        "wo": u(ks[6], (hidden_dim, hidden_dim), hidden_dim),
        "bo": u(ks[7], (1, hidden_dim), hidden_dim),
        "wup": u(ks[8], (d_ff, hidden_dim), hidden_dim),
        "bup": u(ks[9], (1, d_ff), hidden_dim),
        "wdown": u(ks[10], (hidden_dim, d_ff), d_ff),
        "bdown": u(ks[11], (1, hidden_dim), d_ff),
    }


if __name__ == "__main__":
    SEQ, BATCH, HIDDEN = 8, 2, 32
    NUM_HEADS, D_FF = 4, 64

    key = jax.random.PRNGKey(0)
    k_x, k_p = jax.random.split(key)
    x = jax.random.normal(k_x, (SEQ, BATCH, HIDDEN), jnp.float32)
    params = init_params(k_p, HIDDEN, D_FF, NUM_HEADS)

    out, att_weights = encoder_layer(x, params, num_heads=NUM_HEADS)
    out = jax.block_until_ready(out)
    att_weights = [jax.block_until_ready(a) for a in att_weights]

    ref_out, ref_atts = reference_encoder_layer(x, params, num_heads=NUM_HEADS)
    assert out.shape == (SEQ, BATCH, HIDDEN)
    assert len(att_weights) == NUM_HEADS
    assert att_weights[0].shape == (BATCH, SEQ, SEQ)
    assert jnp.allclose(out, ref_out, atol=1e-4, rtol=1e-4)
    for a, r in zip(att_weights, ref_atts):
        assert jnp.allclose(a, r, atol=1e-5, rtol=1e-4)

    print("KERNEL_OK")
</pallas_src>

<mosaic_0001>
module attributes {stable_mosaic.version = 11 : i64} {
  func.func @_encoder_layer_kernel(%arg0: memref<16x32xf32, #tpu.memory_space<vmem>>, %arg1: memref<32x96xf32, #tpu.memory_space<vmem>>, %arg2: memref<1x96xf32, #tpu.memory_space<vmem>>, %arg3: memref<32x32xf32, #tpu.memory_space<vmem>>, %arg4: memref<1x32xf32, #tpu.memory_space<vmem>>, %arg5: memref<32x64xf32, #tpu.memory_space<vmem>>, %arg6: memref<1x64xf32, #tpu.memory_space<vmem>>, %arg7: memref<64x32xf32, #tpu.memory_space<vmem>>, %arg8: memref<1x32xf32, #tpu.memory_space<vmem>>, %arg9: memref<16x32xf32, #tpu.memory_space<vmem>>, %arg10: memref<2x8x32xf32, #tpu.memory_space<vmem>>) attributes {dimension_semantics = [], scalar_prefetch = 0 : i64, scratch_operands = 0 : i64, tpu.core_type = #tpu.core_type<tc>} {
    %c0 = arith.constant 0 : index
    %c0_0 = arith.constant 0 : index
    %0 = vector.load %arg0[%c0, %c0_0] : memref<16x32xf32, #tpu.memory_space<vmem>>, vector<16x32xf32>
    %c0_1 = arith.constant 0 : index
    %c0_2 = arith.constant 0 : index
    %1 = vector.load %arg1[%c0_1, %c0_2] : memref<32x96xf32, #tpu.memory_space<vmem>>, vector<32x96xf32>
    %cst = arith.constant dense<0.000000e+00> : vector<16x96xf32>
    %2 = tpu.matmul %0, %1, %cst {dimension_numbers = #tpu.dot_dimension_numbers<[1], [0], [0], [1], [0, 0, 1, 1], [], []>} : vector<16x32xf32>, vector<32x96xf32>, vector<16x96xf32> -> vector<16x96xf32>
    %c0_3 = arith.constant 0 : index
    %c0_4 = arith.constant 0 : index
    %3 = vector.load %arg2[%c0_3, %c0_4] : memref<1x96xf32, #tpu.memory_space<vmem>>, vector<1x96xf32>
    %4 = vector.broadcast %3 : vector<1x96xf32> to vector<16x96xf32>
    %5 = arith.addf %2, %4 : vector<16x96xf32>
    %6 = vector.extract_strided_slice %5 {offsets = [0, 0], sizes = [16, 8], strides = [1, 1]} : vector<16x96xf32> to vector<16x8xf32>
    %7 = vector.shape_cast %6 : vector<16x8xf32> to vector<2x8x8xf32>
    %8 = vector.extract_strided_slice %5 {offsets = [0, 32], sizes = [16, 8], strides = [1, 1]} : vector<16x96xf32> to vector<16x8xf32>
    %9 = vector.shape_cast %8 : vector<16x8xf32> to vector<2x8x8xf32>
    %10 = vector.extract_strided_slice %5 {offsets = [0, 64], sizes = [16, 8], strides = [1, 1]} : vector<16x96xf32> to vector<16x8xf32>
    %11 = vector.shape_cast %10 : vector<16x8xf32> to vector<2x8x8xf32>
    %cst_5 = arith.constant 0.353553385 : f32
    %12 = vector.broadcast %cst_5 : f32 to vector<2x8x8xf32>
    %13 = arith.mulf %7, %12 : vector<2x8x8xf32>
    "tpu.trace_start"() <{level = 10 : i32, message = "bsd,btd->bst"}> : () -> ()
    %cst_6 = arith.constant dense<0.000000e+00> : vector<2x8x8xf32>
    %14 = tpu.matmul %13, %9, %cst_6 {dimension_numbers = #tpu.dot_dimension_numbers<[2], [2], [1], [1], [0, 0, 0, 1, 1, 1], [0], [0]>} : vector<2x8x8xf32>, vector<2x8x8xf32>, vector<2x8x8xf32> -> vector<2x8x8xf32>
    "tpu.trace_stop"() : () -> ()
    %cst_7 = arith.constant dense<0xFF800000> : vector<2x8xf32>
    %15 = vector.multi_reduction <maximumf>, %14, %cst_7 [2] : vector<2x8x8xf32> to vector<2x8xf32>
    %16 = vector.shape_cast %15 : vector<2x8xf32> to vector<2x8x1xf32>
    %17 = vector.broadcast %16 : vector<2x8x1xf32> to vector<2x8x8xf32>
    %18 = arith.subf %14, %17 : vector<2x8x8xf32>
    %19 = math.exp %18 : vector<2x8x8xf32>
    %cst_8 = arith.constant dense<0.000000e+00> : vector<2x8xf32>
    %20 = vector.multi_reduction <add>, %19, %cst_8 [2] : vector<2x8x8xf32> to vector<2x8xf32>
    %21 = vector.shape_cast %20 : vector<2x8xf32> to vector<2x8x1xf32>
    %22 = tpu.reciprocal %21 : vector<2x8x1xf32> -> vector<2x8x1xf32>
    %23 = vector.broadcast %22 : vector<2x8x1xf32> to vector<2x8x8xf32>
    %24 = arith.mulf %19, %23 : vector<2x8x8xf32>
    "tpu.trace_start"() <{level = 10 : i32, message = "bst,btd->bsd"}> : () -> ()
    %cst_9 = arith.constant dense<0.000000e+00> : vector<2x8x8xf32>
    %25 = tpu.matmul %24, %11, %cst_9 {dimension_numbers = #tpu.dot_dimension_numbers<[2], [1], [1], [2], [0, 0, 0, 1, 1, 2], [0], [0]>} : vector<2x8x8xf32>, vector<2x8x8xf32>, vector<2x8x8xf32> -> vector<2x8x8xf32>
    "tpu.trace_stop"() : () -> ()
    %26 = vector.shape_cast %25 : vector<2x8x8xf32> to vector<16x8xf32>
    %27 = vector.extract_strided_slice %5 {offsets = [0, 8], sizes = [16, 8], strides = [1, 1]} : vector<16x96xf32> to vector<16x8xf32>
    %28 = vector.shape_cast %27 : vector<16x8xf32> to vector<2x8x8xf32>
    %29 = vector.extract_strided_slice %5 {offsets = [0, 40], sizes = [16, 8], strides = [1, 1]} : vector<16x96xf32> to vector<16x8xf32>
    %30 = vector.shape_cast %29 : vector<16x8xf32> to vector<2x8x8xf32>
    %31 = vector.extract_strided_slice %5 {offsets = [0, 72], sizes = [16, 8], strides = [1, 1]} : vector<16x96xf32> to vector<16x8xf32>
    %32 = vector.shape_cast %31 : vector<16x8xf32> to vector<2x8x8xf32>
    %cst_10 = arith.constant 0.353553385 : f32
    %33 = vector.broadcast %cst_10 : f32 to vector<2x8x8xf32>
    %34 = arith.mulf %28, %33 : vector<2x8x8xf32>
    "tpu.trace_start"() <{level = 10 : i32, message = "bsd,btd->bst"}> : () -> ()
    %cst_11 = arith.constant dense<0.000000e+00> : vector<2x8x8xf32>
    %35 = tpu.matmul %34, %30, %cst_11 {dimension_numbers = #tpu.dot_dimension_numbers<[2], [2], [1], [1], [0, 0, 0, 1, 1, 1], [0], [0]>} : vector<2x8x8xf32>, vector<2x8x8xf32>, vector<2x8x8xf32> -> vector<2x8x8xf32>
    "tpu.trace_stop"() : () -> ()
    %cst_12 = arith.constant dense<0xFF800000> : vector<2x8xf32>
    %36 = vector.multi_reduction <maximumf>, %35, %cst_12 [2] : vector<2x8x8xf32> to vector<2x8xf32>
    %37 = vector.shape_cast %36 : vector<2x8xf32> to vector<2x8x1xf32>
    %38 = vector.broadcast %37 : vector<2x8x1xf32> to vector<2x8x8xf32>
    %39 = arith.subf %35, %38 : vector<2x8x8xf32>
    %40 = math.exp %39 : vector<2x8x8xf32>
    %cst_13 = arith.constant dense<0.000000e+00> : vector<2x8xf32>
    %41 = vector.multi_reduction <add>, %40, %cst_13 [2] : vector<2x8x8xf32> to vector<2x8xf32>
    %42 = vector.shape_cast %41 : vector<2x8xf32> to vector<2x8x1xf32>
    %43 = tpu.reciprocal %42 : vector<2x8x1xf32> -> vector<2x8x1xf32>
    %44 = vector.broadcast %43 : vector<2x8x1xf32> to vector<2x8x8xf32>
    %45 = arith.mulf %40, %44 : vector<2x8x8xf32>
    "tpu.trace_start"() <{level = 10 : i32, message = "bst,btd->bsd"}> : () -> ()
    %cst_14 = arith.constant dense<0.000000e+00> : vector<2x8x8xf32>
    %46 = tpu.matmul %45, %32, %cst_14 {dimension_numbers = #tpu.dot_dimension_numbers<[2], [1], [1], [2], [0, 0, 0, 1, 1, 2], [0], [0]>} : vector<2x8x8xf32>, vector<2x8x8xf32>, vector<2x8x8xf32> -> vector<2x8x8xf32>
    "tpu.trace_stop"() : () -> ()
    %47 = vector.shape_cast %46 : vector<2x8x8xf32> to vector<16x8xf32>
    %48 = vector.extract_strided_slice %5 {offsets = [0, 16], sizes = [16, 8], strides = [1, 1]} : vector<16x96xf32> to vector<16x8xf32>
    %49 = vector.shape_cast %48 : vector<16x8xf32> to vector<2x8x8xf32>
    %50 = vector.extract_strided_slice %5 {offsets = [0, 48], sizes = [16, 8], strides = [1, 1]} : vector<16x96xf32> to vector<16x8xf32>
    %51 = vector.shape_cast %50 : vector<16x8xf32> to vector<2x8x8xf32>
    %52 = vector.extract_strided_slice %5 {offsets = [0, 80], sizes = [16, 8], strides = [1, 1]} : vector<16x96xf32> to vector<16x8xf32>
    %53 = vector.shape_cast %52 : vector<16x8xf32> to vector<2x8x8xf32>
    %cst_15 = arith.constant 0.353553385 : f32
    %54 = vector.broadcast %cst_15 : f32 to vector<2x8x8xf32>
    %55 = arith.mulf %49, %54 : vector<2x8x8xf32>
    "tpu.trace_start"() <{level = 10 : i32, message = "bsd,btd->bst"}> : () -> ()
    %cst_16 = arith.constant dense<0.000000e+00> : vector<2x8x8xf32>
    %56 = tpu.matmul %55, %51, %cst_16 {dimension_numbers = #tpu.dot_dimension_numbers<[2], [2], [1], [1], [0, 0, 0, 1, 1, 1], [0], [0]>} : vector<2x8x8xf32>, vector<2x8x8xf32>, vector<2x8x8xf32> -> vector<2x8x8xf32>
    "tpu.trace_stop"() : () -> ()
    %cst_17 = arith.constant dense<0xFF800000> : vector<2x8xf32>
    %57 = vector.multi_reduction <maximumf>, %56, %cst_17 [2] : vector<2x8x8xf32> to vector<2x8xf32>
    %58 = vector.shape_cast %57 : vector<2x8xf32> to vector<2x8x1xf32>
    %59 = vector.broadcast %58 : vector<2x8x1xf32> to vector<2x8x8xf32>
    %60 = arith.subf %56, %59 : vector<2x8x8xf32>
    %61 = math.exp %60 : vector<2x8x8xf32>
    %cst_18 = arith.constant dense<0.000000e+00> : vector<2x8xf32>
    %62 = vector.multi_reduction <add>, %61, %cst_18 [2] : vector<2x8x8xf32> to vector<2x8xf32>
    %63 = vector.shape_cast %62 : vector<2x8xf32> to vector<2x8x1xf32>
    %64 = tpu.reciprocal %63 : vector<2x8x1xf32> -> vector<2x8x1xf32>
    %65 = vector.broadcast %64 : vector<2x8x1xf32> to vector<2x8x8xf32>
    %66 = arith.mulf %61, %65 : vector<2x8x8xf32>
    "tpu.trace_start"() <{level = 10 : i32, message = "bst,btd->bsd"}> : () -> ()
    %cst_19 = arith.constant dense<0.000000e+00> : vector<2x8x8xf32>
    %67 = tpu.matmul %66, %53, %cst_19 {dimension_numbers = #tpu.dot_dimension_numbers<[2], [1], [1], [2], [0, 0, 0, 1, 1, 2], [0], [0]>} : vector<2x8x8xf32>, vector<2x8x8xf32>, vector<2x8x8xf32> -> vector<2x8x8xf32>
    "tpu.trace_stop"() : () -> ()
    %68 = vector.shape_cast %67 : vector<2x8x8xf32> to vector<16x8xf32>
    %69 = vector.extract_strided_slice %5 {offsets = [0, 24], sizes = [16, 8], strides = [1, 1]} : vector<16x96xf32> to vector<16x8xf32>
    %70 = vector.shape_cast %69 : vector<16x8xf32> to vector<2x8x8xf32>
    %71 = vector.extract_strided_slice %5 {offsets = [0, 56], sizes = [16, 8], strides = [1, 1]} : vector<16x96xf32> to vector<16x8xf32>
    %72 = vector.shape_cast %71 : vector<16x8xf32> to vector<2x8x8xf32>
    %73 = vector.extract_strided_slice %5 {offsets = [0, 88], sizes = [16, 8], strides = [1, 1]} : vector<16x96xf32> to vector<16x8xf32>
    %74 = vector.shape_cast %73 : vector<16x8xf32> to vector<2x8x8xf32>
    %cst_20 = arith.constant 0.353553385 : f32
    %75 = vector.broadcast %cst_20 : f32 to vector<2x8x8xf32>
    %76 = arith.mulf %70, %75 : vector<2x8x8xf32>
    "tpu.trace_start"() <{level = 10 : i32, message = "bsd,btd->bst"}> : () -> ()
    %cst_21 = arith.constant dense<0.000000e+00> : vector<2x8x8xf32>
    %77 = tpu.matmul %76, %72, %cst_21 {dimension_numbers = #tpu.dot_dimension_numbers<[2], [2], [1], [1], [0, 0, 0, 1, 1, 1], [0], [0]>} : vector<2x8x8xf32>, vector<2x8x8xf32>, vector<2x8x8xf32> -> vector<2x8x8xf32>
    "tpu.trace_stop"() : () -> ()
    %cst_22 = arith.constant dense<0xFF800000> : vector<2x8xf32>
    %78 = vector.multi_reduction <maximumf>, %77, %cst_22 [2] : vector<2x8x8xf32> to vector<2x8xf32>
    %79 = vector.shape_cast %78 : vector<2x8xf32> to vector<2x8x1xf32>
    %80 = vector.broadcast %79 : vector<2x8x1xf32> to vector<2x8x8xf32>
    %81 = arith.subf %77, %80 : vector<2x8x8xf32>
    %82 = math.exp %81 : vector<2x8x8xf32>
    %cst_23 = arith.constant dense<0.000000e+00> : vector<2x8xf32>
    %83 = vector.multi_reduction <add>, %82, %cst_23 [2] : vector<2x8x8xf32> to vector<2x8xf32>
    %84 = vector.shape_cast %83 : vector<2x8xf32> to vector<2x8x1xf32>
    %85 = tpu.reciprocal %84 : vector<2x8x1xf32> -> vector<2x8x1xf32>
    %86 = vector.broadcast %85 : vector<2x8x1xf32> to vector<2x8x8xf32>
    %87 = arith.mulf %82, %86 : vector<2x8x8xf32>
    "tpu.trace_start"() <{level = 10 : i32, message = "bst,btd->bsd"}> : () -> ()
    %cst_24 = arith.constant dense<0.000000e+00> : vector<2x8x8xf32>
    %88 = tpu.matmul %87, %74, %cst_24 {dimension_numbers = #tpu.dot_dimension_numbers<[2], [1], [1], [2], [0, 0, 0, 1, 1, 2], [0], [0]>} : vector<2x8x8xf32>, vector<2x8x8xf32>, vector<2x8x8xf32> -> vector<2x8x8xf32>
    "tpu.trace_stop"() : () -> ()
    %89 = vector.shape_cast %88 : vector<2x8x8xf32> to vector<16x8xf32>
    %90 = tpu.concatenate %24, %45, %66, %87 in 2 : vector<2x8x8xf32>, vector<2x8x8xf32>, vector<2x8x8xf32>, vector<2x8x8xf32> -> vector<2x8x32xf32>
    %c0_25 = arith.constant 0 : index
    %c0_26 = arith.constant 0 : index
    %c0_27 = arith.constant 0 : index
    %91 = vector.load %arg10[%c0_25, %c0_26, %c0_27] : memref<2x8x32xf32, #tpu.memory_space<vmem>>, vector<2x8x32xf32>
    tpu.vector_store %arg10[%c0_25, %c0_26, %c0_27], %90 {strides = array<i32>} : memref<2x8x32xf32, #tpu.memory_space<vmem>>, vector<2x8x32xf32>,
    %92 = tpu.concatenate %26, %47, %68, %89 in 1 : vector<16x8xf32>, vector<16x8xf32>, vector<16x8xf32>, vector<16x8xf32> -> vector<16x32xf32>
    %c0_28 = arith.constant 0 : index
    %c0_29 = arith.constant 0 : index
    %93 = vector.load %arg3[%c0_28, %c0_29] : memref<32x32xf32, #tpu.memory_space<vmem>>, vector<32x32xf32>
    %cst_30 = arith.constant dense<0.000000e+00> : vector<16x32xf32>
    %94 = tpu.matmul %92, %93, %cst_30 {dimension_numbers = #tpu.dot_dimension_numbers<[1], [0], [0], [1], [0, 0, 1, 1], [], []>} : vector<16x32xf32>, vector<32x32xf32>, vector<16x32xf32> -> vector<16x32xf32>
    %c0_31 = arith.constant 0 : index
    %c0_32 = arith.constant 0 : index
    %95 = vector.load %arg4[%c0_31, %c0_32] : memref<1x32xf32, #tpu.memory_space<vmem>>, vector<1x32xf32>
    %96 = vector.broadcast %95 : vector<1x32xf32> to vector<16x32xf32>
    %97 = arith.addf %94, %96 : vector<16x32xf32>
    %c0_33 = arith.constant 0 : index
    %c0_34 = arith.constant 0 : index
    %98 = vector.load %arg5[%c0_33, %c0_34] : memref<32x64xf32, #tpu.memory_space<vmem>>, vector<32x64xf32>
    %cst_35 = arith.constant dense<0.000000e+00> : vector<16x64xf32>
    %99 = tpu.matmul %97, %98, %cst_35 {dimension_numbers = #tpu.dot_dimension_numbers<[1], [0], [0], [1], [0, 0, 1, 1], [], []>} : vector<16x32xf32>, vector<32x64xf32>, vector<16x64xf32> -> vector<16x64xf32>
    %c0_36 = arith.constant 0 : index
    %c0_37 = arith.constant 0 : index
    %100 = vector.load %arg6[%c0_36, %c0_37] : memref<1x64xf32, #tpu.memory_space<vmem>>, vector<1x64xf32>
    %101 = vector.broadcast %100 : vector<1x64xf32> to vector<16x64xf32>
    %102 = arith.addf %99, %101 : vector<16x64xf32>
    %cst_38 = arith.constant 0.000000e+00 : f32
    %103 = vector.broadcast %cst_38 : f32 to vector<16x64xf32>
    %104 = arith.maximumf %102, %103 : vector<16x64xf32>
    %c0_39 = arith.constant 0 : index
    %c0_40 = arith.constant 0 : index
    %105 = vector.load %arg7[%c0_39, %c0_40] : memref<64x32xf32, #tpu.memory_space<vmem>>, vector<64x32xf32>
    %cst_41 = arith.constant dense<0.000000e+00> : vector<16x32xf32>
    %106 = tpu.matmul %104, %105, %cst_41 {dimension_numbers = #tpu.dot_dimension_numbers<[1], [0], [0], [1], [0, 0, 1, 1], [], []>} : vector<16x64xf32>, vector<64x32xf32>, vector<16x32xf32> -> vector<16x32xf32>
    %c0_42 = arith.constant 0 : index
    %c0_43 = arith.constant 0 : index
    %107 = vector.load %arg8[%c0_42, %c0_43] : memref<1x32xf32, #tpu.memory_space<vmem>>, vector<1x32xf32>
    %108 = vector.broadcast %107 : vector<1x32xf32> to vector<16x32xf32>
    %109 = arith.addf %106, %108 : vector<16x32xf32>
    %c0_44 = arith.constant 0 : index
    %c0_45 = arith.constant 0 : index
    %110 = vector.load %arg9[%c0_44, %c0_45] : memref<16x32xf32, #tpu.memory_space<vmem>>, vector<16x32xf32>
    tpu.vector_store %arg9[%c0_44, %c0_45], %109 {strides = array<i32>} : memref<16x32xf32, #tpu.memory_space<vmem>>, vector<16x32xf32>,
    return
  }
}

</mosaic_0001>

<bundles_post_ra>
// kernel: tpu_custom_call.1
= control target key start
LH: loop header
LB: loop body
LE: loop exit
PB: predicated region body
PF: predicated region fallthrough
CT: control target
= control target key end

     0   :  { %16 = vsyncpa [#allocation3], 0  ;;  %s1426_s0 = inlined_call_operand.hbm [shape: f32[16,32], index: 0, kind: input, shape index: {}]   ;;  %s1427_s1 = inlined_call_operand.vmem [shape: f32[32,96], index: 1, kind: input, shape index: {}]   ;;  %s1428_s2 = inlined_call_operand.vmem [shape: f32[1,96], index: 2, kind: input, shape index: {}]   ;;  %s1429_s3 = inlined_call_operand.vmem [shape: f32[32,32], index: 3, kind: input, shape index: {}]   ;;  %s1430_s4 = inlined_call_operand.vmem [shape: f32[1,32], index: 4, kind: input, shape index: {}]   ;;  %s1431_s5 = inlined_call_operand.vmem [shape: f32[32,64], index: 5, kind: input, shape index: {}]   ;;  %s1432_s6 = inlined_call_operand.vmem [shape: f32[1,64], index: 6, kind: input, shape index: {}]   ;;  %s1433_s7 = inlined_call_operand.vmem [shape: f32[64,32], index: 7, kind: input, shape index: {}]   ;;  %s1434_s8 = inlined_call_operand.vmem [shape: f32[1,32], index: 8, kind: input, shape index: {}]   ;;  %s1435_s9 = inlined_call_operand.hbm [shape: f32[16,32], index: 9, kind: output, shape index: {0}]   ;;  %s1436_s10 = inlined_call_operand.hbm [shape: f32[2,8,32], index: 10, kind: output, shape index: {1}]  }
   0x1   :  { %17 = vsyncpa [#allocation4], 0 }
   0x2   :  { %18 = vsyncpa [#allocation7], 0  ;;  %s23_s15 = sshll.u32 %s1426_s0, 4  ;;  %s1098_s16 = smov [#allocation2]   ;;  %s24_s15 = int_to_ptr.hbm [resolvable:$true] %s23_s15 }
   0x3   :  { %s25_s17 = sshll.u32 %s1098_s16, 4  ;;  %s1099_s18 = smov 128   ;;  %s26_s17 = int_to_ptr.vmem [resolvable:$true] %s25_s17 }
   0x4   :  { %s1100_s19 = smov 8  }
   0x5   :  { %31 = dma.hbm_to_vmem [thread:$0]  %s24_s15, 256, %s26_s17, [#allocation3], %s1099_s18, %s1099_s18, %s1100_s19  }
   0x6   :  { %1092 = dma.done.wait [#allocation3], 256  }
   0x7   :  { %1093 = vsyncadd [#allocation3], 4294967040  ;;  %v57_v0 = vld [vmem:[%s1427_s1 + $0x18] sm:$0xff]  ;;  %v56_v1 = vld [vmem:[%s1427_s1 + $0x10] sm:$0xff]  ;;  %vm62_vm0 = vcmask 261120   ;;  %s1101_s29 = smov 64  }
   0x8   :  { %81 = vmatpush.msra.mxu0 %v57_v0  ;;  %v55_v2 = vld [vmem:[%s1427_s1 + $0x8] sm:$0xff]  ;;  %v54_v3 = vld [vmem:[%s1427_s1] sm:$0xff]  ;;  %s1102_s1 = smov 96   ;;  %s1103_s30 = smov 88   ;;  %vm97_vm1 = vcmask 64512  }
   0x9   :  { %v52_v4 = vld [vmem:[#allocation2] sm:$0xff]  ;;  %v53_v5 = vld [vmem:[#allocation2 + $0x8] sm:$0xff]  ;;  %s1105_s11 = smov 80   ;;  %s1106_s12 = smov 112  }
   0xa   :  { %82 = vmatpush.msra.mxu0 %v56_v1  ;;  %v984_v6 = vld [vmem:[%s1428_s2] ss:$0 sm:$0xff]  ;;  %s1104_s2 = smov 120   ;;  %s1107_s13 = smov 104  }
   0xb   :  { %s1108_s14 = smov 72   ;;  %s1109_s15 = smov 56  }
   0xc   :  { %83 = vmatpush.msra.mxu0 %v55_v2  ;;  %s1110_s16 = smov 40   ;;  %s1111_s17 = smov 48  }
   0xd   :  { %s1112_s20 = smov 16   ;;  %s1113_s21 = smov 24  }
   0xe   :  { %84 = vmatpush.msra.mxu0 %v54_v3 }
   0xf   :  { %934 = vmatmul.msk.f32.vlgmr.msra.gmra.mxu0 %vm62_vm0, %v52_v4 }
  0x17   :  { %935 = vmatmul.msk.f32.gmra.mxu0 %vm62_vm0, %v53_v5 }
  0x8c   :  { %v86_v7 = vpop.f32.mrf.mxu0 }
  0x8d   :  { %v1194_v8 = vadd.f32 %v984_v6, %v86_v7 }
  0x8f   :  { %199 = vrot.lane.b32.xlu2 %v1194_v8, %s1101_s29  ;;  %95 = vrot.lane.b32.xlu0 %v1194_v8, %s1102_s1  ;;  %v92_v12 = vmul.f32 0.35355338, %v1194_v8 }
  0x94   :  { %v89_v9 = vpop.f32.mrf.mxu0 }
  0x95   :  { %v1199_v10 = vadd.f32 %v984_v6, %v89_v9 }
  0x97   :  { %124 = vrot.lane.b32.xlu1 %v1199_v10, %s1102_s1  ;;  %281 = vrot.lane.b32.xlu2 %v1199_v10, %s1103_s30  ;;  %v93_v11 = vmul.f32 0.35355338, %v1199_v10 }
  0x9f   :  { %279 = vrot.lane.b32.xlu2 %v93_v11, %s1104_s2  ;;  %251 = vrot.lane.b32.xlu1 %v92_v12, %s1104_s2  ;;  %s1114_s2 = smov [#allocation6]  }
  0xa7   :  { %253 = vrot.lane.b32.xlu2 %v1194_v8, %s1103_s30 }
  0xaf   :  { %409 = vrot.lane.b32.xlu2 %v1194_v8, %s1105_s11 }
  0xb7   :  { %407 = vrot.lane.b32.xlu2 %v92_v12, %s1106_s12 }
  0xbf   :  { %563 = vrot.lane.b32.xlu2 %v92_v12, %s1107_s13 }
  0xc7   :  { %593 = vrot.lane.b32.xlu2 %v1199_v10, %s1108_s14 }
  0xe9   :  { %v200_v13 = vpop.permute.xlu2 %199 }
  0xf1   :  { %v282_v14 = vpop.permute.xlu2 %281 }
  0xf9   :  { %v280_v15 = vpop.permute.xlu2 %279 }
 0x101   :  { %v96_v16 = vpop.permute.xlu0 %95  ;;  %v254_v17 = vpop.permute.xlu2 %253 }
 0x102   :  { %936 = vmatpush.xpose.msk.msra.mxu1 %vm97_vm1, %v96_v16 }
 0x105   :  { %937 = vmatmul.msk.f32.vlgmr.msra.gmra.mxu1 %vm97_vm1, %v92_v12 }
 0x106   :  { %220 = vmatpush.msrb.mxu1 %v200_v13 }
 0x108   :  { %942 = vmatpush.xpose.msk.msra.mxu1 %vm97_vm1, %v254_v17 }
 0x109   :  { %v125_v18 = vpop.permute.xlu1 %124  ;;  %v410_v19 = vpop.permute.xlu2 %409 }
 0x10a   :  { %938 = vmatpush.xpose.msk.msra.mxu2 %vm97_vm1, %v125_v18 }
 0x10d   :  { %939 = vmatmul.msk.f32.vlgmr.msra.gmra.mxu2 %vm97_vm1, %v93_v11 }
 0x10e   :  { %944 = vmatpush.xpose.msk.msrb.mxu2 %vm97_vm1, %v282_v14 }
 0x111   :  { %v408_v20 = vpop.permute.xlu2 %407  ;;  %v252_v34 = vpop.permute.xlu1 %251 }
 0x112   :  { %948 = vmatpush.xpose.msk.msra.mxu2 %vm97_vm1, %v410_v19 }
 0x115   :  { %945 = vmatmul.msk.f32.vlgmr.msrb.gmra.mxu2 %vm97_vm1, %v280_v15 }
 0x119   :  { %v564_v48 = vpop.permute.xlu2 %563 }
 0x11d   :  { %949 = vmatmul.msk.f32.vlgmr.msra.gmra.mxu2 %vm97_vm1, %v408_v20 }
 0x121   :  { %v594_v50 = vpop.permute.xlu2 %593 }
 0x182   :  { %v120_v21 = vpop.f32.mrf.mxu1 }
 0x183   :  { %v151_v22 = vsel %vm97_vm1, %v120_v21, -inf }
 0x184   :  { %152 = vmax.xlane.f32.xlu0 %v151_v22 }
 0x190   :  { %v148_v23 = vpop.f32.mrf.mxu2 }
 0x191   :  { %v154_v24 = vsel %vm97_vm1, %v148_v23, -inf }
 0x192   :  { %155 = vmax.xlane.f32.xlu2 %v154_v24 }
 0x198   :  { %435 = vrot.lane.b32.xlu0 %v93_v11, %s1106_s12  ;;  %v304_v25 = vpop.f32.mrf.mxu2 }
 0x199   :  { %v310_v33 = vsel %vm97_vm1, %v304_v25, -inf }
 0x19a   :  { %311 = vmax.xlane.f32.xlu2 %v310_v33 }
 0x1a0   :  { %v1221_v26 = vpop.f32.mrf.mxu2 }
 0x1a1   :  { %v463_v27 = vsel %vm97_vm1, %v1221_v26, -inf }
 0x1c2   :  { %464 = vmax.xlane.f32.xlu0 %v463_v27 }
 0x1f7   :  { %v153_v28 = vpop.xlane.xlu0 %152 }
 0x1f8   :  { %v157_v29 = vsub.f32 %v120_v21, %v153_v28 }
 0x1fa   :  { %v159_v30 = vmul.f32 1.442695, %v157_v29 }
 0x1fc   :  { %988 = vpow2.f32 %v159_v30 }
 0x202   :  { %v989_v31 = vpop.eup %988 }
 0x203   :  { %v163_v32 = vsel %vm97_vm1, %v989_v31, 0.0 }
 0x204   :  { %164 = vadd.xlane.f32.xlu1 %v163_v32 }
 0x205   :  { %v156_v53 = vpop.xlane.xlu2 %155 }
 0x206   :  { %v158_v56 = vsub.f32 %v148_v23, %v156_v53 }
 0x208   :  { %v161_v60 = vmul.f32 1.442695, %v158_v56 }
 0x20a   :  { %v436_v51 = vpop.permute.xlu0 %435 }
 0x20d   :  { %v312_v55 = vpop.xlane.xlu2 %311 }
 0x20e   :  { %v314_v58 = vsub.f32 %v304_v25, %v312_v55 }
 0x210   :  { %v317_v62 = vmul.f32 1.442695, %v314_v58 }
 0x21d   :  { %565 = vrot.lane.b32.xlu1 %v1194_v8, %s1108_s14 }
 0x225   :  { %437 = vrot.lane.b32.xlu1 %v1199_v10, %s1105_s11  ;;  %s914_s11 = sshll.u32 %s1114_s2, 4  ;;  %s915_s11 = int_to_ptr.vmem [resolvable:$true] %s914_s11 }
 0x22d   :  { %591 = vrot.lane.b32.xlu1 %v93_v11, %s1107_s13 }
 0x235   :  { %v465_v61 = vpop.xlane.xlu0 %464 }
 0x236   :  { %v469_v0 = vsub.f32 %v1221_v26, %v465_v61 }
 0x238   :  { %v471_v4 = vmul.f32 1.442695, %v469_v0 }
 0x277   :  { %v165_v35 = vpop.xlane.xlu1 %164 }
 0x278   :  { %990 = vrcp.f32 %v165_v35  ;;  %v180_v39 = vand.u32 2147483648, %v165_v35  ;;  %v178_v41 = vand.u32 2147483647, %v165_v35  ;;  %vm174_vm3 = vweird.f32 %v165_v35 }
 0x279   :  { %992 = vpow2.f32 %v161_v60 }
 0x27a   :  { %v181_v43 = vor.u32 1.1754944e-38, %v180_v39  ;;  %vm179_vm5 = vcmp.eq.f32.partialorder %v178_v41, 8.507059e+37  ;;  %994 = vpow2.f32 %v317_v62 }
 0x27b   :  { %996 = vpow2.f32 %v471_v4 }
 0x27e   :  { %v991_v36 = vpop.eup %990 }
 0x27f   :  { %v170_v37 = vmul.f32 %v991_v36, %v165_v35  ;;  %vm175_vm2 = vweird.f32 %v991_v36  ;;  %v1248_v5 = vpop.eup %992 }
 0x280   :  { %vm176_vm4 = vmor %vm174_vm3, %vm175_vm2  ;;  %v1250_v6 = vpop.eup %994  ;;  %v166_v9 = vsel %vm97_vm1, %v1248_v5, 0.0 }
 0x281   :  { %v171_v38 = vsub.f32 1.0, %v170_v37  ;;  %v322_v12 = vsel %vm97_vm1, %v1250_v6, 0.0  ;;  %v1257_v13 = vpop.eup %996 }
 0x282   :  { %v475_v14 = vsel %vm97_vm1, %v1257_v13, 0.0 }
 0x283   :  { %v172_v40 = vmul.f32 %v991_v36, %v171_v38 }
 0x285   :  { %v173_v42 = vadd.f32 %v991_v36, %v172_v40 }
 0x287   :  { %v177_v44 = vsel %vm176_vm4, %v991_v36, %v173_v42 }
 0x288   :  { %v182_v45 = vsel %vm179_vm5, %v181_v43, %v177_v44 }
 0x289   :  { %v1231_v46 = vmul.f32 %v989_v31, %v182_v45 }
 0x28b   :  { %940 = vmatmul.msk.f32.vlgmr.msrb.gmra.mxu1 %vm97_vm1, %v1231_v46 }
 0x28f   :  { %v566_v47 = vpop.permute.xlu1 %565 }
 0x290   :  { %954 = vmatpush.xpose.msk.msrb.mxu2 %vm97_vm1, %v566_v47 }
 0x293   :  { %943 = vmatmul.msk.f32.vlgmr.msra.gmra.mxu1 %vm97_vm1, %v252_v34  ;;  %955 = vmatmul.msk.f32.vlgmr.msrb.gmra.mxu2 %vm97_vm1, %v564_v48 }
 0x297   :  { %v438_v49 = vpop.permute.xlu1 %437 }
 0x298   :  { %950 = vmatpush.xpose.msk.msrb.mxu0 %vm97_vm1, %v438_v49 }
 0x29b   :  { %951 = vmatmul.msk.f32.vlgmr.msrb.gmra.mxu0 %vm97_vm1, %v436_v51 }
 0x29c   :  { %956 = vmatpush.xpose.msk.msra.mxu0 %vm97_vm1, %v594_v50 }
 0x29f   :  { %v592_v52 = vpop.permute.xlu1 %591 }
 0x2a3   :  { %957 = vmatmul.msk.f32.vlgmr.msra.gmra.mxu0 %vm97_vm1, %v592_v52 }
 0x308   :  { %v1242_v54 = vpop.f32.mrf.mxu1 }
 0x310   :  { %v276_v57 = vpop.f32.mrf.mxu1 }
 0x311   :  { %v307_v59 = vsel %vm97_vm1, %v276_v57, -inf }
 0x312   :  { %308 = vmax.xlane.f32.xlu1 %v307_v59 }
 0x316   :  { %v588_v63 = vpop.f32.mrf.mxu2 }
 0x317   :  { %v619_v2 = vsel %vm97_vm1, %v588_v63, -inf }
 0x318   :  { %v460_v1 = vpop.f32.mrf.mxu0 }
 0x319   :  { %v466_v3 = vsel %vm97_vm1, %v460_v1, -inf }
 0x31a   :  { %620 = vmax.xlane.f32.xlu1 %v619_v2  ;;  %467 = vmax.xlane.f32.xlu0 %v466_v3 }
 0x320   :  { %v616_v7 = vpop.f32.mrf.mxu0 }
 0x321   :  { %v622_v11 = vsel %vm97_vm1, %v616_v7, -inf }
 0x322   :  { %167 = vadd.xlane.f32.xlu1 %v166_v9  ;;  %623 = vmax.xlane.f32.xlu2 %v622_v11 }
 0x323   :  { %323 = vadd.xlane.f32.xlu0 %v322_v12 }
 0x32a   :  { %476 = vadd.xlane.f32.xlu2 %v475_v14 }
 0x337   :  { %355 = vrot.lane.b32.xlu0 %v1194_v8, %s1109_s15 }
 0x33b   :  { %225 = vrot.lane.b32.xlu1 %v1199_v10, %s1101_s29 }
 0x33f   :  { %381 = vrot.lane.b32.xlu0 %v1199_v10, %s1109_s15  ;;  %s1115_s15 = smov [#allocation5]  }
 0x385   :  { %v309_v15 = vpop.xlane.xlu1 %308 }
 0x386   :  { %v313_v16 = vsub.f32 %v276_v57, %v309_v15 }
 0x388   :  { %v315_v17 = vmul.f32 1.442695, %v313_v16 }
 0x38a   :  { %998 = vpow2.f32 %v315_v17 }
 0x38d   :  { %v621_v18 = vpop.xlane.xlu1 %620  ;;  %v468_v19 = vpop.xlane.xlu0 %467 }
 0x38e   :  { %v625_v20 = vsub.f32 %v588_v63, %v621_v18  ;;  %v470_v23 = vsub.f32 %v460_v1, %v468_v19 }
 0x390   :  { %v1265_v21 = vpop.eup %998  ;;  %v627_v22 = vmul.f32 1.442695, %v625_v20  ;;  %v473_v25 = vmul.f32 1.442695, %v470_v23 }
 0x391   :  { %v319_v24 = vsel %vm97_vm1, %v1265_v21, 0.0 }
 0x392   :  { %1000 = vpow2.f32 %v627_v22  ;;  %320 = vadd.xlane.f32.xlu0 %v319_v24 }
 0x395   :  { %v168_v26 = vpop.xlane.xlu1 %167  ;;  %v624_v27 = vpop.xlane.xlu2 %623 }
 0x396   :  { %1002 = vrcp.f32 %v168_v26  ;;  %v626_v28 = vsub.f32 %v616_v7, %v624_v27  ;;  %v324_v29 = vpop.xlane.xlu0 %323  ;;  %v194_v47 = vand.u32 2147483648, %v168_v26  ;;  %vm188_vm7 = vweird.f32 %v168_v26 }
 0x397   :  { %1004 = vrcp.f32 %v324_v29  ;;  %v192_v48 = vand.u32 2147483647, %v168_v26  ;;  %v350_v52 = vand.u32 2147483648, %v324_v29  ;;  %vm344_vm10 = vweird.f32 %v324_v29 }
 0x398   :  { %v1269_v30 = vpop.eup %1000  ;;  %1006 = vpow2.f32 %v473_v25  ;;  %v629_v31 = vmul.f32 1.442695, %v626_v28  ;;  %v195_v51 = vor.u32 1.1754944e-38, %v194_v47  ;;  %v348_v53 = vand.u32 2147483647, %v324_v29 }
 0x399   :  { %v631_v32 = vsel %vm97_vm1, %v1269_v30, 0.0  ;;  %vm193_vm11 = vcmp.eq.f32.partialorder %v192_v48, 8.507059e+37  ;;  %v351_v58 = vor.u32 1.1754944e-38, %v350_v52 }
 0x39a   :  { %1008 = vpow2.f32 %v629_v31  ;;  %632 = vadd.xlane.f32.xlu2 %v631_v32  ;;  %vm349_vm13 = vcmp.eq.f32.partialorder %v348_v53, 8.507059e+37 }
 0x39c   :  { %v1003_v33 = vpop.eup %1002 }
 0x39d   :  { %v1005_v34 = vpop.eup %1004  ;;  %v184_v35 = vmul.f32 %v1003_v33, %v168_v26  ;;  %vm189_vm6 = vweird.f32 %v1003_v33  ;;  %v477_v0 = vpop.xlane.xlu2 %476 }
 0x39e   :  { %v1273_v36 = vpop.eup %1006  ;;  %v340_v37 = vmul.f32 %v1005_v34, %v324_v29  ;;  %vm190_vm8 = vmor %vm188_vm7, %vm189_vm6  ;;  %vm345_vm9 = vweird.f32 %v1005_v34  ;;  %1010 = vrcp.f32 %v477_v0  ;;  %v492_v24 = vand.u32 2147483648, %v477_v0 }
 0x39f   :  { %v185_v38 = vsub.f32 1.0, %v184_v35  ;;  %v478_v43 = vsel %vm97_vm1, %v1273_v36, 0.0  ;;  %vm346_vm12 = vmor %vm344_vm10, %vm345_vm9  ;;  %vm486_vm5 = vweird.f32 %v477_v0  ;;  %v490_v26 = vand.u32 2147483647, %v477_v0 }
 0x3a0   :  { %v1275_v39 = vpop.eup %1008  ;;  %v341_v40 = vsub.f32 1.0, %v340_v37  ;;  %v493_v31 = vor.u32 1.1754944e-38, %v492_v24 }
 0x3a1   :  { %v186_v41 = vmul.f32 %v1003_v33, %v185_v38  ;;  %v634_v42 = vsel %vm97_vm1, %v1275_v39, 0.0  ;;  %vm491_vm7 = vcmp.eq.f32.partialorder %v490_v26, 8.507059e+37  ;;  %v817_v26 = vld [vmem:[%s1431_s5 + $0x18] sm:$0xff] }
 0x3a2   :  { %635 = vadd.xlane.f32.xlu1 %v634_v42  ;;  %479 = vadd.xlane.f32.xlu2 %v478_v43  ;;  %v342_v44 = vmul.f32 %v1005_v34, %v341_v40 }
 0x3a3   :  { %v187_v45 = vadd.f32 %v1003_v33, %v186_v41  ;;  %840 = vmatpush.msrb.mxu0 %v817_v26 }
 0x3a4   :  { %v343_v49 = vadd.f32 %v1005_v34, %v342_v44  ;;  %v1011_v2 = vpop.eup %1010 }
 0x3a5   :  { %v191_v50 = vsel %vm190_vm8, %v1003_v33, %v187_v45  ;;  %v482_v3 = vmul.f32 %v1011_v2, %v477_v0  ;;  %vm487_vm3 = vweird.f32 %v1011_v2 }
 0x3a6   :  { %667 = vrot.lane.b32.xlu0 %v1194_v8, %s1110_s16  ;;  %v196_v56 = vsel %vm193_vm11, %v195_v51, %v191_v50  ;;  %v347_v57 = vsel %vm346_vm12, %v1005_v34, %v343_v49  ;;  %vm488_vm6 = vmor %vm486_vm5, %vm487_vm3 }
 0x3a7   :  { %v1283_v60 = vmul.f32 %v1248_v5, %v196_v56  ;;  %v352_v61 = vsel %vm349_vm13, %v351_v58, %v347_v57 }
 0x3a8   :  { %v1289_v63 = vmul.f32 %v1250_v6, %v352_v61  ;;  %v483_v6 = vsub.f32 1.0, %v482_v3 }
 0x3a9   :  { %v356_v55 = vpop.permute.xlu0 %355 }
 0x3aa   :  { %v484_v12 = vmul.f32 %v1011_v2, %v483_v6 }
 0x3ac   :  { %v485_v22 = vadd.f32 %v1011_v2, %v484_v12 }
 0x3ad   :  { %v226_v59 = vpop.permute.xlu1 %225 }
 0x3ae   :  { %246 = vmatpush.msra.mxu3 %v226_v59  ;;  %693 = vrot.lane.b32.xlu0 %v1199_v10, %s1110_s16  ;;  %v489_v29 = vsel %vm488_vm6, %v1011_v2, %v485_v22  ;;  %vm739_vm6 = vcmask 130048   ;;  %s901_s16 = sshll.u32 %s1115_s15, 4  ;;  %s902_s16 = int_to_ptr.vmem [resolvable:$true] %s901_s16 }
 0x3af   :  { %941 = vmatmul.msk.f32.vlgmr.msra.gmra.mxu3 %vm97_vm1, %v1283_v60  ;;  %v494_v37 = vsel %vm491_vm7, %v493_v31, %v489_v29  ;;  %vm742_vm7 = vcmask 195584  }
 0x3b0   :  { %376 = vmatpush.msrb.mxu3 %v356_v55  ;;  %v509_v45 = vmul.f32 %v1257_v13, %v494_v37 }
 0x3b1   :  { %v382_v62 = vpop.permute.xlu0 %381 }
 0x3b2   :  { %402 = vmatpush.msrb.mxu1 %v382_v62 }
 0x3b3   :  { %947 = vmatmul.msk.f32.vlgmr.msrb.gmra.mxu1 %vm97_vm1, %v1289_v63 }
 0x3ba   :  { %511 = vrot.lane.b32.xlu2 %v1194_v8, %s1111_s17 }
 0x3c2   :  { %537 = vrot.lane.b32.xlu2 %v1199_v10, %s1111_s17 }
 0x405   :  { %v321_v1 = vpop.xlane.xlu0 %320 }
 0x406   :  { %1012 = vrcp.f32 %v321_v1  ;;  %v336_v8 = vand.u32 2147483648, %v321_v1  ;;  %vm330_vm15 = vweird.f32 %v321_v1  ;;  %v334_v10 = vand.u32 2147483647, %v321_v1 }
 0x408   :  { %v337_v23 = vor.u32 1.1754944e-38, %v336_v8  ;;  %vm335_vm4 = vcmp.eq.f32.partialorder %v334_v10, 8.507059e+37  ;;  %v779_v10 = vld [vmem:[%s1429_s3 + $0x10] sm:$0xff] }
 0x40c   :  { %v1013_v4 = vpop.eup %1012 }
 0x40d   :  { %v326_v5 = vmul.f32 %v1013_v4, %v321_v1  ;;  %v1295_v7 = vpop.xlane.xlu2 %632  ;;  %vm331_vm14 = vweird.f32 %v1013_v4 }
 0x40e   :  { %1014 = vrcp.f32 %v1295_v7  ;;  %vm1298_vm2 = vmor %vm330_vm15, %vm331_vm14  ;;  %v648_v43 = vand.u32 2147483648, %v1295_v7  ;;  %vm642_vm9 = vweird.f32 %v1295_v7  ;;  %v646_v47 = vand.u32 2147483647, %v1295_v7 }
 0x40f   :  { %v327_v9 = vsub.f32 1.0, %v326_v5 }
 0x410   :  { %v649_v53 = vor.u32 1.1754944e-38, %v648_v43  ;;  %vm647_vm13 = vcmp.eq.f32.partialorder %v646_v47, 8.507059e+37  ;;  %v815_v43 = vld [vmem:[%s1431_s5 + $0x8] sm:$0xff] }
 0x411   :  { %v328_v11 = vmul.f32 %v1013_v4, %v327_v9  ;;  %v858_v47 = vld [vmem:[%s1433_s7 + $0x28] sm:$0xff] }
 0x413   :  { %v329_v14 = vadd.f32 %v1013_v4, %v328_v11 }
 0x414   :  { %v1015_v15 = vpop.eup %1014 }
 0x415   :  { %v638_v17 = vmul.f32 %v1015_v15, %v1295_v7  ;;  %v1303_v18 = vpop.xlane.xlu1 %635  ;;  %v480_v19 = vpop.xlane.xlu2 %479  ;;  %v333_v20 = vsel %vm1298_vm2, %v1013_v4, %v329_v14  ;;  %vm643_vm8 = vweird.f32 %v1015_v15 }
 0x416   :  { %1016 = vrcp.f32 %v1303_v18  ;;  %v338_v27 = vsel %vm335_vm4, %v337_v23, %v333_v20  ;;  %v504_v48 = vand.u32 2147483647, %v480_v19  ;;  %v506_v49 = vand.u32 2147483648, %v480_v19  ;;  %vm644_vm10 = vmor %vm642_vm9, %vm643_vm8 }
 0x417   :  { %v639_v25 = vsub.f32 1.0, %v638_v17  ;;  %1018 = vrcp.f32 %v480_v19  ;;  %v1309_v28 = vmul.f32 %v1265_v21, %v338_v27  ;;  %vm500_vm12 = vweird.f32 %v480_v19  ;;  %v816_v27 = vld [vmem:[%s1431_s5 + $0x10] sm:$0xff] }
 0x418   :  { %v668_v34 = vpop.permute.xlu0 %667  ;;  %vm505_vm15 = vcmp.eq.f32.partialorder %v504_v48, 8.507059e+37  ;;  %v507_v13 = vor.u32 1.1754944e-38, %v506_v49  ;;  %v662_v62 = vand.u32 2147483648, %v1303_v18  ;;  %vm656_vm3 = vweird.f32 %v1303_v18  ;;  %841 = vmatpush.msrb.mxu0 %v816_v27  ;;  %v857_v48 = vld [vmem:[%s1433_s7 + $0x20] sm:$0xff]  ;;  %v856_v49 = vld [vmem:[%s1433_s7 + $0x18] sm:$0xff] }
 0x419   :  { %v640_v32 = vmul.f32 %v1015_v15, %v639_v25  ;;  %946 = vmatmul.msk.f32.vlgmr.msrb.gmra.mxu3 %vm97_vm1, %v1309_v28  ;;  %v660_v1 = vand.u32 2147483647, %v1303_v18 }
 0x41a   :  { %v663_v5 = vor.u32 1.1754944e-38, %v662_v62  ;;  %842 = vmatpush.msrb.mxu0 %v815_v43 }
 0x41b   :  { %v641_v42 = vadd.f32 %v1015_v15, %v640_v32  ;;  %vm661_vm5 = vcmp.eq.f32.partialorder %v660_v1, 8.507059e+37 }
 0x41c   :  { %v1017_v33 = vpop.eup %1016 }
 0x41d   :  { %v1019_v35 = vpop.eup %1018  ;;  %v652_v38 = vmul.f32 %v1017_v33, %v1303_v18  ;;  %v512_v40 = vpop.permute.xlu2 %511  ;;  %v645_v52 = vsel %vm644_vm10, %v1015_v15, %v641_v42  ;;  %vm657_vm2 = vweird.f32 %v1017_v33  ;;  %v778_v15 = vld [vmem:[%s1429_s3 + $0x8] sm:$0xff] }
 0x41e   :  { %v496_v41 = vmul.f32 %v1019_v35, %v480_v19  ;;  %532 = vmatpush.msra.mxu3 %v512_v40  ;;  %vm501_vm11 = vweird.f32 %v1019_v35  ;;  %v650_v57 = vsel %vm647_vm13, %v649_v53, %v645_v52  ;;  %vm658_vm4 = vmor %vm656_vm3, %vm657_vm2 }
 0x41f   :  { %v653_v21 = vsub.f32 1.0, %v652_v38  ;;  %vm502_vm14 = vmor %vm500_vm12, %vm501_vm11  ;;  %v665_v3 = vmul.f32 %v1269_v30, %v650_v57  ;;  %v853_v57 = vld [vmem:[%s1433_s7] sm:$0xff] }
 0x420   :  { %688 = vmatpush.msrb.mxu3 %v668_v34  ;;  %v497_v44 = vsub.f32 1.0, %v496_v41  ;;  %v694_v61 = vpop.permute.xlu0 %693 }
 0x421   :  { %v654_v50 = vmul.f32 %v1017_v33, %v653_v21  ;;  %952 = vmatmul.msk.f32.vlgmr.msra.gmra.mxu3 %vm97_vm1, %v509_v45 }
 0x422   :  { %v498_v51 = vmul.f32 %v1019_v35, %v497_v44  ;;  %v814_v44 = vld [vmem:[%s1431_s5] sm:$0xff] }
 0x423   :  { %v655_v58 = vadd.f32 %v1017_v33, %v654_v50  ;;  %843 = vmatpush.msrb.mxu0 %v814_v44  ;;  %v985_v50 = vld [vmem:[%s1430_s4] ss:$0 sm:$0xff] }
 0x424   :  { %v499_v55 = vadd.f32 %v1019_v35, %v498_v51 }
 0x425   :  { %v538_v56 = vpop.permute.xlu2 %537  ;;  %v659_v4 = vsel %vm658_vm4, %v1017_v33, %v655_v58  ;;  %v986_v58 = vld [vmem:[%s1432_s6] ss:$0 sm:$0xff] }
 0x426   :  { %v503_v59 = vsel %vm502_vm14, %v1019_v35, %v499_v55  ;;  %558 = vmatpush.msra.mxu1 %v538_v56  ;;  %v664_v7 = vsel %vm661_vm5, %v663_v5, %v659_v4  ;;  %v854_v56 = vld [vmem:[%s1433_s7 + $0x8] sm:$0xff] }
 0x427   :  { %v508_v0 = vsel %vm505_vm15, %v507_v13, %v503_v59  ;;  %v666_v6 = vmul.f32 %v1275_v39, %v664_v7  ;;  %v780_v39 = vld [vmem:[%s1429_s3 + $0x18] sm:$0xff]  ;;  %v855_v13 = vld [vmem:[%s1433_s7 + $0x10] sm:$0xff] }
 0x428   :  { %714 = vmatpush.msrb.mxu1 %v694_v61  ;;  %v510_v2 = vmul.f32 %v1273_v36, %v508_v0  ;;  %803 = vmatpush.msra.mxu2 %v780_v39 }
 0x429   :  { %958 = vmatmul.msk.f32.vlgmr.msrb.gmra.mxu3 %vm97_vm1, %v665_v3 }
 0x42a   :  { %953 = vmatmul.msk.f32.vlgmr.msra.gmra.mxu1 %vm97_vm1, %v510_v2  ;;  %804 = vmatpush.msra.mxu2 %v779_v10 }
 0x42c   :  { %805 = vmatpush.msra.mxu2 %v778_v15 }
 0x430   :  { %v404_v12 = vpop.f32.mrf.mxu1 }
 0x432   :  { %959 = vmatmul.msk.f32.vlgmr.msrb.gmra.mxu1 %vm97_vm1, %v666_v6  ;;  %v248_v9 = vpop.f32.mrf.mxu3 }
 0x49c   :  { %v378_v11 = vpop.f32.mrf.mxu3 }
 0x49d   :  { %749 = vrot.lane.b32.xlu2 %v378_v11, %s1100_s19 }
 0x4a4   :  { %v534_v36 = vpop.f32.mrf.mxu3 }
 0x4a5   :  { %757 = vrot.lane.b32.xlu0 %v534_v36, %s1112_s20 }
 0x4a7   :  { %v560_v30 = vpop.f32.mrf.mxu1 }
 0x4a8   :  { %759 = vrot.lane.b32.xlu1 %v560_v30, %s1112_s20 }
 0x4ac   :  { %v690_v8 = vpop.f32.mrf.mxu3 }
 0x4ad   :  { %751 = vrot.lane.b32.xlu0 %v404_v12, %s1100_s19  ;;  %765 = vrot.lane.b32.xlu2 %v690_v8, %s1113_s21 }
 0x4af   :  { %v716_v14 = vpop.f32.mrf.mxu1 }
 0x4b0   :  { %733 = vrot.lane.b32.xlu1 %v666_v6, %s1113_s21 }
 0x4b5   :  { %719 = vrot.lane.b32.xlu0 %v1309_v28, %s1100_s19  ;;  %767 = vrot.lane.b32.xlu2 %v716_v14, %s1113_s21 }
 0x4bd   :  { %725 = vrot.lane.b32.xlu0 %v509_v45, %s1112_s20  ;;  %721 = vrot.lane.b32.xlu2 %v1289_v63, %s1100_s19  ;;  %v777_v63 = vld [vmem:[%s1429_s3] sm:$0xff]  ;;  %v859_v45 = vld [vmem:[%s1433_s7 + $0x30] sm:$0xff] }
 0x4be   :  { %806 = vmatpush.msra.mxu2 %v777_v63 }
 0x4c5   :  { %731 = vrot.lane.b32.xlu0 %v665_v3, %s1113_s21  ;;  %727 = vrot.lane.b32.xlu2 %v510_v2, %s1112_s20  ;;  %v987_v3 = vld [vmem:[%s1434_s8] ss:$0 sm:$0xff] }
 0x4f7   :  { %v750_v16 = vpop.permute.xlu2 %749 }
 0x4f8   :  { %v771_v19 = vsel %vm97_vm1, %v1242_v54, %v750_v16 }
 0x507   :  { %v766_v17 = vpop.permute.xlu2 %765 }
 0x50f   :  { %v768_v18 = vpop.permute.xlu2 %767 }
 0x517   :  { %v722_v20 = vpop.permute.xlu2 %721  ;;  %v758_v22 = vpop.permute.xlu0 %757 }
 0x518   :  { %v773_v23 = vsel %vm739_vm6, %v771_v19, %v758_v22  ;;  %v738_v54 = vsel %vm97_vm1, %v1283_v60, %v722_v20 }
 0x519   :  { %v775_v25 = vsel %vm742_vm7, %v773_v23, %v766_v17 }
 0x51a   :  { %v760_v24 = vpop.permute.xlu1 %759  ;;  %960 = vmatmul.msk.f32.vlgmr.msra.gmra.mxu2 %vm62_vm0, %v775_v25 }
 0x51f   :  { %v728_v28 = vpop.permute.xlu2 %727  ;;  %v752_v29 = vpop.permute.xlu0 %751 }
 0x520   :  { %v741_v31 = vsel %vm739_vm6, %v738_v54, %v728_v28  ;;  %v772_v32 = vsel %vm97_vm1, %v248_v9, %v752_v29 }
 0x521   :  { %v774_v35 = vsel %vm739_vm6, %v772_v32, %v760_v24 }
 0x522   :  { %v734_v33 = vpop.permute.xlu1 %733  ;;  %v776_v37 = vsel %vm742_vm7, %v774_v35, %v768_v18 }
 0x523   :  { %v744_v34 = vsel %vm742_vm7, %v741_v31, %v734_v33  ;;  %961 = vmatmul.msk.f32.gmra.mxu2 %vm62_vm0, %v776_v37 }
 0x524   :  { %746 = vst.msk [vmem:[#allocation6 + $0x8] sm:$0xff] %vm62_vm0, %v744_v34 }
 0x527   :  { %v720_v38 = vpop.permute.xlu0 %719 }
 0x528   :  { %v737_v60 = vsel %vm97_vm1, %v1231_v46, %v720_v38  ;;  %v860_v46 = vld [vmem:[%s1433_s7 + $0x38] sm:$0xff]  ;;  %vm865_vm1 = vcmask 523264   ;;  %s916_s7 = sshll.u32 %s1436_s10, 4  ;;  %s903_s10 = sshll.u32 %s1435_s9, 4  ;;  %s917_s7 = int_to_ptr.hbm [resolvable:$true] %s916_s7  ;;  %s904_s10 = int_to_ptr.hbm [resolvable:$true] %s903_s10 }
 0x529   :  { %880 = vmatpush.msra.mxu3 %v860_v46 }
 0x52b   :  { %881 = vmatpush.msra.mxu3 %v859_v45 }
 0x52d   :  { %882 = vmatpush.msra.mxu3 %v858_v47 }
 0x52f   :  { %v726_v40 = vpop.permute.xlu0 %725  ;;  %883 = vmatpush.msra.mxu3 %v857_v48 }
 0x530   :  { %v740_v41 = vsel %vm739_vm6, %v737_v60, %v726_v40 }
 0x531   :  { %884 = vmatpush.msra.mxu3 %v856_v49 }
 0x533   :  { %885 = vmatpush.msra.mxu3 %v855_v13 }
 0x535   :  { %886 = vmatpush.msra.mxu3 %v854_v56 }
 0x537   :  { %v732_v42 = vpop.permute.xlu0 %731  ;;  %887 = vmatpush.msra.mxu3 %v853_v57 }
 0x538   :  { %v743_v21 = vsel %vm742_vm7, %v740_v41, %v732_v42 }
 0x539   :  { %745 = vst.msk [vmem:[#allocation6] sm:$0xff] %vm62_vm0, %v743_v21 }
 0x53a   :  { %922 = dma.vmem_to_hbm [thread:$0]  %s915_s11, 256, %s917_s7, [#allocation7], %s1099_s18, %s1099_s18, %s1100_s19  }
 0x59d   :  { %v808_v51 = vpop.f32.mrf.mxu2 }
 0x59e   :  { %v809_v52 = vadd.f32 %v985_v50, %v808_v51 }
 0x5a0   :  { %962 = vmatmul.msk.f32.vlgmr.msrb.gmra.mxu0 %vm62_vm0, %v809_v52 }
 0x5a6   :  { %v811_v53 = vpop.f32.mrf.mxu2 }
 0x5a7   :  { %v812_v55 = vadd.f32 %v985_v50, %v811_v53 }
 0x5a9   :  { %963 = vmatmul.msk.f32.gmra.mxu0 %vm62_vm0, %v812_v55 }
 0x61d   :  { %v845_v59 = vpop.f32.mrf.mxu0 }
 0x61e   :  { %v846_v61 = vadd.f32 %v986_v58, %v845_v59 }
 0x620   :  { %v851_v62 = vmax.f32 %v846_v61, 0.0 }
 0x622   :  { %964 = vmatmul.msk.f32.vlgmr.msra.gmra.mxu3 %vm865_vm1, %v851_v62 }
 0x626   :  { %v848_v0 = vpop.f32.mrf.mxu0 }
 0x627   :  { %v849_v1 = vadd.f32 %v986_v58, %v848_v0 }
 0x629   :  { %v852_v2 = vmax.f32 %v849_v1, 0.0 }
 0x62b   :  { %965 = vmatmul.msk.f32.gmra.mxu3 %vm865_vm1, %v852_v2 }
 0x6a5   :  { %v889_v4 = vpop.f32.mrf.mxu3 }
 0x6a6   :  { %v890_v5 = vadd.f32 %v987_v3, %v889_v4 }
 0x6a8   :  { %895 = vst.msk [vmem:[#allocation5] sm:$0xff] %vm62_vm0, %v890_v5 }
 0x6ae   :  { %v892_v7 = vpop.f32.mrf.mxu3 }
 0x6af   :  { %v893_v6 = vadd.f32 %v987_v3, %v892_v7 }
 0x6b1   :  { %896 = vst.msk [vmem:[#allocation5 + $0x8] sm:$0xff] %vm62_vm0, %v893_v6 }
 0x6b2   :  { %909 = dma.vmem_to_hbm [thread:$0]  %s902_s16, 256, %s904_s10, [#allocation4], %s1099_s18, %s1099_s18, %s1100_s19  }
 0x6b3   :  { %1094 = dma.done.wait [#allocation4], 256  }
 0x6b4   :  { %1095 = vsyncadd [#allocation4], 4294967040 }
 0x6b5   :  { %1096 = dma.done.wait [#allocation7], 256  }
 0x6b6   :  { %1097 = vsyncadd [#allocation7], 4294967040 }
 0x6b7   :  { %931 = vsyncpa [#allocation3], 1 }
 0x6b8   :  { %932 = vsyncpa [#allocation4], 1 }
 0x6b9   :  { %933 = vsyncpa [#allocation7], 1 }

</bundles_post_ra>
